<compile_context>
chip_gen: v7x
topology: tpu7x:2x2x1
jax: 0.10.0
libtpu: 0.0.40
codegen_flags: <defaults>
</compile_context>

<pallas_src>
import functools
from typing import NamedTuple, Sequence, Union

import jax
import jax.numpy as jnp
from jax.experimental import pallas as pl
from jax.experimental.pallas import tpu as pltpu


class BlendParams(NamedTuple):
    sigma: float = 1e-4
    gamma: float = 1e-4
    background_color: Union[float, Sequence[float]] = (0.0,)


class Fragments(NamedTuple):
    pix_to_face: jax.Array   # (N, H, W, K) int32, -1 marks empty fragments
    bary_coords: jax.Array   # (N, H, W, K, 3) float32
    zbuf: jax.Array          # (N, H, W, K) float32
    dists: jax.Array         # (N, H, W, K) float32


# ----------------------------------------------------------------------------
# Pallas kernel: softmax blend over the K face samples of each pixel.
# ----------------------------------------------------------------------------
def _softmax_blend_kernel(pix_ref, dists_ref, zbuf_ref, colors_ref, bg_ref,
                          out_ref, *, num_k, sigma, gamma, znear, zfar, eps):
    # In-kernel shapes (TP = pixel tile, lane axis):
    #   pix_ref    (K, TP) int32
    #   dists_ref  (K, TP) f32
    #   zbuf_ref   (K, TP) f32
    #   colors_ref (K, C, TP) bf16
    #   bg_ref     (C, 1) f32
    #   out_ref    (C, TP) f32
    tp = out_ref.shape[-1]
    inv_sigma = 1.0 / sigma
    inv_gamma = 1.0 / gamma
    inv_zrange = 1.0 / (zfar - znear)

    # Unrolled K loop: per-pixel prob, inverse depth, running max (clamped to
    # eps, which matches torch.clamp(min=eps)).  All (1, TP) f32 per-lane work.
    probs = []
    z_invs = []
    z_inv_max = jnp.full((1, tp), eps, dtype=jnp.float32)
    for k in range(num_k):
        valid = pix_ref[k:k + 1, :] >= 0
        prob_k = jnp.where(
            valid, jax.nn.sigmoid(-dists_ref[k:k + 1, :] * inv_sigma), 0.0)
        z_inv_k = jnp.where(
            valid, (zfar - zbuf_ref[k:k + 1, :]) * inv_zrange, 0.0)
        probs.append(prob_k)
        z_invs.append(z_inv_k)
        z_inv_max = jnp.maximum(z_inv_max, z_inv_k)

    # Background delta term (EUP exp; clamp min=eps as in the reference).
    delta = jnp.maximum(jnp.exp((eps - z_inv_max) * inv_gamma), eps)

    denom = delta                           # (1, TP)
    acc = delta * bg_ref[...]               # (1, TP) * (C, 1) -> (C, TP)
    for k in range(num_k):
        w_k = probs[k] * jnp.exp((z_invs[k] - z_inv_max) * inv_gamma)
        denom = denom + w_k
        acc = acc + w_k * colors_ref[k].astype(jnp.float32)   # bf16 -> f32 accumulate

    out_ref[...] = acc * pl.reciprocal(denom, approx=True)


# ----------------------------------------------------------------------------
# Wrapper: layout plumbing + tiling + pallas_call.
# ----------------------------------------------------------------------------
def softmax_blend_pallas(colors, pix_to_face, dists, zbuf, blend_params,
                         znear=1.0, zfar=100.0, eps=1e-10):
    """Multi-channel softmax blend (pytorch3d softmax_rgb_blend generalization)."""
    N, H, W, K = pix_to_face.shape
    C = colors.shape[-1]
    P = N * H * W

    # --- wrapper-side layout plumbing: put pixels on the lane axis -----------
    colors_l = jnp.transpose(colors.reshape(P, K, C), (1, 2, 0)).astype(jnp.bfloat16)
    pix_l = pix_to_face.reshape(P, K).T.astype(jnp.int32)
    dists_l = dists.reshape(P, K).T.astype(jnp.float32)
    zbuf_l = zbuf.reshape(P, K).T.astype(jnp.float32)
    bg = jnp.broadcast_to(
        jnp.asarray(blend_params.background_color, jnp.float32).reshape(-1), (C,)
    ).reshape(C, 1)

    # --- pick the pixel tile: biggest lane-dense tile within a conservative
    # double-buffered VMEM budget (fits v7x's 64 MiB VMEM per TC too).
    bytes_per_pixel = K * C * 2 + 3 * K * 4 + C * 4       # colors + pix/dists/zbuf + out
    vmem_budget = 16 * 1024 * 1024
    cap = (vmem_budget // (2 * bytes_per_pixel)) // 128 * 128
    cap = int(max(128, min(cap, 8192)))
    num_tiles = -(-P // cap)
    tile_p = -(-P // num_tiles)
    tile_p = ((tile_p + 127) // 128) * 128
    p_pad = tile_p * num_tiles

    pad = p_pad - P
    if pad:
        # Padded pixels: pix_to_face = -1 (invalid) so they blend to background
        # and contribute no NaN/Inf to the exp/max path.
        colors_l = jnp.pad(colors_l, ((0, 0), (0, 0), (0, pad)))
        pix_l = jnp.pad(pix_l, ((0, 0), (0, pad)), constant_values=-1)
        dists_l = jnp.pad(dists_l, ((0, 0), (0, pad)))
        zbuf_l = jnp.pad(zbuf_l, ((0, 0), (0, pad)))

    kernel = functools.partial(
        _softmax_blend_kernel,
        num_k=K,
        sigma=float(blend_params.sigma),
        gamma=float(blend_params.gamma),
        znear=float(znear),
        zfar=float(zfar),
        eps=float(eps),
    )

    out = pl.pallas_call(
        kernel,
        out_shape=jax.ShapeDtypeStruct((C, p_pad), jnp.float32),
        grid_spec=pltpu.PrefetchScalarGridSpec(
            num_scalar_prefetch=0,
            grid=(p_pad // tile_p,),
            in_specs=[
                pl.BlockSpec((K, tile_p), lambda i: (0, i)),        # pix_to_face
                pl.BlockSpec((K, tile_p), lambda i: (0, i)),        # dists
                pl.BlockSpec((K, tile_p), lambda i: (0, i)),        # zbuf
                pl.BlockSpec((K, C, tile_p), lambda i: (0, 0, i)),  # colors (bf16)
                pl.BlockSpec((C, 1), lambda i: (0, 0)),             # background
            ],
            out_specs=pl.BlockSpec((C, tile_p), lambda i: (0, i)),
        ),
        compiler_params=pltpu.CompilerParams(
            # "parallel" shards the P grid over v7x's 2 TensorCores; measured
            # no-op on single-TC v5e/v6e, so safe unconditionally.
            dimension_semantics=("parallel",),
            vmem_limit_bytes=48 * 1024 * 1024,
        ),
    )(pix_l, dists_l, zbuf_l, colors_l, bg)

    return out[:, :P].T.reshape(N, H, W, C)


# ----------------------------------------------------------------------------
# Plain-JAX glue: TexturesVertex sampling (barycentric interpolation).
# ----------------------------------------------------------------------------
def sample_textures_vertex(fragments, faces, verts_features):
    faces_feats = verts_features[faces]                 # (F, 3, C)
    safe_pix = jnp.maximum(fragments.pix_to_face, 0)
    pix_feats = faces_feats[safe_pix]                   # (N, H, W, K, 3, C)
    texels = jnp.sum(fragments.bary_coords[..., None] * pix_feats, axis=-2)
    return texels                                       # (N, H, W, K, C)


class FeatureShader:
    """JAX/Pallas port of the PyTorch FeatureShader (per-vertex feature shading
    with softmax blending)."""

    def __init__(self, blend_params=None):
        self.blend_params = blend_params if blend_params is not None else BlendParams()

    def forward(self, fragments, verts_features, faces, feature_tex=None, **kwargs):
        blend_params = kwargs.get("blend_params", self.blend_params)
        feats = feature_tex if feature_tex is not None else verts_features
        texels = sample_textures_vertex(fragments, faces, feats)
        return softmax_blend_pallas(
            texels, fragments.pix_to_face, fragments.dists, fragments.zbuf,
            blend_params,
            znear=kwargs.get("znear", 1.0), zfar=kwargs.get("zfar", 100.0))

    __call__ = forward


# ----------------------------------------------------------------------------
# Pure-JAX f32 reference (mirrors the PyTorch softmax_blend exactly).
# ----------------------------------------------------------------------------
def softmax_blend_reference(colors, pix_to_face, dists, zbuf, blend_params,
                            znear=1.0, zfar=100.0, eps=1e-10):
    C = colors.shape[-1]
    mask = (pix_to_face >= 0).astype(jnp.float32)
    prob_map = jax.nn.sigmoid(-dists / blend_params.sigma) * mask
    z_inv = (zfar - zbuf) / (zfar - znear) * mask
    z_inv_max = jnp.maximum(jnp.max(z_inv, axis=-1, keepdims=True), eps)
    weights_num = prob_map * jnp.exp((z_inv - z_inv_max) / blend_params.gamma)
    delta = jnp.maximum(jnp.exp((eps - z_inv_max) / blend_params.gamma), eps)
    denom = jnp.sum(weights_num, axis=-1, keepdims=True) + delta
    background = jnp.broadcast_to(
        jnp.asarray(blend_params.background_color, jnp.float32).reshape(-1), (C,))
    weighted_colors = jnp.sum(weights_num[..., None] * colors, axis=-2)
    return (weighted_colors + delta * background) / denom


if __name__ == "__main__":
    key = jax.random.PRNGKey(0)
    N, H, W, K, C = 2, 16, 16, 4, 8
    V, F = 128, 256
    ks = jax.random.split(key, 6)

    verts_features = jax.random.uniform(ks[0], (V, C), jnp.float32)
    faces = jax.random.randint(ks[1], (F, 3), 0, V, dtype=jnp.int32)
    pix_to_face = jax.random.randint(ks[2], (N, H, W, K), -1, F, dtype=jnp.int32)
    bary = jax.random.uniform(ks[3], (N, H, W, K, 3), jnp.float32, 1e-3, 1.0)
    bary = bary / jnp.sum(bary, axis=-1, keepdims=True)
    dists = jax.random.uniform(ks[4], (N, H, W, K), jnp.float32, -1e-2, 1e-2)
    zbuf = jnp.where(
        pix_to_face >= 0,
        jax.random.uniform(ks[5], (N, H, W, K), jnp.float32, 1.5, 50.0),
        -1.0)

    blend_params = BlendParams(
        sigma=1e-2, gamma=1e-2,
        background_color=tuple(0.25 + 0.05 * i for i in range(C)))

    fragments = Fragments(pix_to_face=pix_to_face, bary_coords=bary,
                          zbuf=zbuf, dists=dists)
    shader = FeatureShader(blend_params=blend_params)

    images = shader(fragments, verts_features, faces)
    images = jax.block_until_ready(images)
    assert images.shape == (N, H, W, C)

    # Correctness check against the pure-JAX f32 reference (bf16 colors +
    # approx reciprocal in the kernel -> loose tolerance).
    texels = sample_textures_vertex(fragments, faces, verts_features)
    ref = softmax_blend_reference(texels, pix_to_face, dists, zbuf, blend_params)
    err = float(jnp.max(jnp.abs(images - ref)))
    assert err < 2e-2, f"max abs error {err}"

    print("KERNEL_OK")
</pallas_src>

<mosaic_0001>
module attributes {stable_mosaic.version = 11 : i64} {
  func.func @_softmax_blend_kernel(%arg0: i32, %arg1: memref<4x512xi32, #tpu.memory_space<vmem>>, %arg2: memref<4x512xf32, #tpu.memory_space<vmem>>, %arg3: memref<4x512xf32, #tpu.memory_space<vmem>>, %arg4: memref<4x8x512xbf16, #tpu.memory_space<vmem>>, %arg5: memref<8x1xf32, #tpu.memory_space<vmem>>, %arg6: memref<8x512xf32, #tpu.memory_space<vmem>>) attributes {dimension_semantics = [#tpu.dimension_semantics<parallel>], iteration_bounds = array<i64: 1>, scalar_prefetch = 0 : i64, scratch_operands = 0 : i64, tpu.core_type = #tpu.core_type<tc>, window_params = [{transform_indices = @transform_0, window_bounds = array<i64: 4, 512>}, {transform_indices = @transform_1, window_bounds = array<i64: 4, 512>}, {transform_indices = @transform_2, window_bounds = array<i64: 4, 512>}, {transform_indices = @transform_3, window_bounds = array<i64: 4, 8, 512>}, {pipeline_mode = #tpu.pipeline_mode<synchronous>, transform_indices = @transform_4, window_bounds = array<i64: 8, 1>}, {transform_indices = @transform_5, window_bounds = array<i64: 8, 512>}]} {
    %cst = arith.constant 1.000000e-10 : f32
    %0 = vector.broadcast %cst : f32 to vector<1x512xf32>
    %c0 = arith.constant 0 : index
    %c0_0 = arith.constant 0 : index
    %1 = vector.load %arg1[%c0, %c0_0] : memref<4x512xi32, #tpu.memory_space<vmem>>, vector<1x512xi32>
    %c0_i32 = arith.constant 0 : i32
    %2 = vector.broadcast %c0_i32 : i32 to vector<1x512xi32>
    %3 = arith.cmpi sge, %1, %2 : vector<1x512xi32>
    %c0_1 = arith.constant 0 : index
    %c0_2 = arith.constant 0 : index
    %4 = vector.load %arg2[%c0_1, %c0_2] : memref<4x512xf32, #tpu.memory_space<vmem>>, vector<1x512xf32>
    %cst_3 = arith.constant 0.000000e+00 : f32
    %5 = vector.broadcast %cst_3 : f32 to vector<1x512xf32>
    %6 = arith.subf %5, %4 : vector<1x512xf32>
    %cst_4 = arith.constant 1.000000e+02 : f32
    %7 = vector.broadcast %cst_4 : f32 to vector<1x512xf32>
    %8 = arith.mulf %6, %7 : vector<1x512xf32>
    %9 = arith.negf %8 : vector<1x512xf32>
    %10 = math.exp %9 : vector<1x512xf32>
    %cst_5 = arith.constant 1.000000e+00 : f32
    %11 = vector.broadcast %cst_5 : f32 to vector<1x512xf32>
    %12 = arith.addf %11, %10 : vector<1x512xf32>
    %13 = arith.divf %11, %12 : vector<1x512xf32>
    %cst_6 = arith.constant 0.000000e+00 : f32
    %14 = vector.broadcast %cst_6 : f32 to vector<1x512xf32>
    %15 = arith.select %3, %13, %14 : vector<1x512xi1>, vector<1x512xf32>
    %c0_7 = arith.constant 0 : index
    %c0_8 = arith.constant 0 : index
    %16 = vector.load %arg3[%c0_7, %c0_8] : memref<4x512xf32, #tpu.memory_space<vmem>>, vector<1x512xf32>
    %cst_9 = arith.constant 1.000000e+02 : f32
    %17 = vector.broadcast %cst_9 : f32 to vector<1x512xf32>
    %18 = arith.subf %17, %16 : vector<1x512xf32>
    %cst_10 = arith.constant 0.0101010101 : f32
    %19 = vector.broadcast %cst_10 : f32 to vector<1x512xf32>
    %20 = arith.mulf %18, %19 : vector<1x512xf32>
    %cst_11 = arith.constant 0.000000e+00 : f32
    %21 = vector.broadcast %cst_11 : f32 to vector<1x512xf32>
    %22 = arith.select %3, %20, %21 : vector<1x512xi1>, vector<1x512xf32>
    %23 = arith.maximumf %0, %22 : vector<1x512xf32>
    %c1 = arith.constant 1 : index
    %c0_12 = arith.constant 0 : index
    %24 = vector.load %arg1[%c1, %c0_12] : memref<4x512xi32, #tpu.memory_space<vmem>>, vector<1x512xi32>
    %c0_i32_13 = arith.constant 0 : i32
    %25 = vector.broadcast %c0_i32_13 : i32 to vector<1x512xi32>
    %26 = arith.cmpi sge, %24, %25 : vector<1x512xi32>
    %c1_14 = arith.constant 1 : index
    %c0_15 = arith.constant 0 : index
    %27 = vector.load %arg2[%c1_14, %c0_15] : memref<4x512xf32, #tpu.memory_space<vmem>>, vector<1x512xf32>
    %cst_16 = arith.constant 0.000000e+00 : f32
    %28 = vector.broadcast %cst_16 : f32 to vector<1x512xf32>
    %29 = arith.subf %28, %27 : vector<1x512xf32>
    %cst_17 = arith.constant 1.000000e+02 : f32
    %30 = vector.broadcast %cst_17 : f32 to vector<1x512xf32>
    %31 = arith.mulf %29, %30 : vector<1x512xf32>
    %32 = arith.negf %31 : vector<1x512xf32>
    %33 = math.exp %32 : vector<1x512xf32>
    %cst_18 = arith.constant 1.000000e+00 : f32
    %34 = vector.broadcast %cst_18 : f32 to vector<1x512xf32>
    %35 = arith.addf %34, %33 : vector<1x512xf32>
    %36 = arith.divf %34, %35 : vector<1x512xf32>
    %cst_19 = arith.constant 0.000000e+00 : f32
    %37 = vector.broadcast %cst_19 : f32 to vector<1x512xf32>
    %38 = arith.select %26, %36, %37 : vector<1x512xi1>, vector<1x512xf32>
    %c1_20 = arith.constant 1 : index
    %c0_21 = arith.constant 0 : index
    %39 = vector.load %arg3[%c1_20, %c0_21] : memref<4x512xf32, #tpu.memory_space<vmem>>, vector<1x512xf32>
    %cst_22 = arith.constant 1.000000e+02 : f32
    %40 = vector.broadcast %cst_22 : f32 to vector<1x512xf32>
    %41 = arith.subf %40, %39 : vector<1x512xf32>
    %cst_23 = arith.constant 0.0101010101 : f32
    %42 = vector.broadcast %cst_23 : f32 to vector<1x512xf32>
    %43 = arith.mulf %41, %42 : vector<1x512xf32>
    %cst_24 = arith.constant 0.000000e+00 : f32
    %44 = vector.broadcast %cst_24 : f32 to vector<1x512xf32>
    %45 = arith.select %26, %43, %44 : vector<1x512xi1>, vector<1x512xf32>
    %46 = arith.maximumf %23, %45 : vector<1x512xf32>
    %c2 = arith.constant 2 : index
    %c0_25 = arith.constant 0 : index
    %47 = vector.load %arg1[%c2, %c0_25] : memref<4x512xi32, #tpu.memory_space<vmem>>, vector<1x512xi32>
    %c0_i32_26 = arith.constant 0 : i32
    %48 = vector.broadcast %c0_i32_26 : i32 to vector<1x512xi32>
    %49 = arith.cmpi sge, %47, %48 : vector<1x512xi32>
    %c2_27 = arith.constant 2 : index
    %c0_28 = arith.constant 0 : index
    %50 = vector.load %arg2[%c2_27, %c0_28] : memref<4x512xf32, #tpu.memory_space<vmem>>, vector<1x512xf32>
    %cst_29 = arith.constant 0.000000e+00 : f32
    %51 = vector.broadcast %cst_29 : f32 to vector<1x512xf32>
    %52 = arith.subf %51, %50 : vector<1x512xf32>
    %cst_30 = arith.constant 1.000000e+02 : f32
    %53 = vector.broadcast %cst_30 : f32 to vector<1x512xf32>
    %54 = arith.mulf %52, %53 : vector<1x512xf32>
    %55 = arith.negf %54 : vector<1x512xf32>
    %56 = math.exp %55 : vector<1x512xf32>
    %cst_31 = arith.constant 1.000000e+00 : f32
    %57 = vector.broadcast %cst_31 : f32 to vector<1x512xf32>
    %58 = arith.addf %57, %56 : vector<1x512xf32>
    %59 = arith.divf %57, %58 : vector<1x512xf32>
    %cst_32 = arith.constant 0.000000e+00 : f32
    %60 = vector.broadcast %cst_32 : f32 to vector<1x512xf32>
    %61 = arith.select %49, %59, %60 : vector<1x512xi1>, vector<1x512xf32>
    %c2_33 = arith.constant 2 : index
    %c0_34 = arith.constant 0 : index
    %62 = vector.load %arg3[%c2_33, %c0_34] : memref<4x512xf32, #tpu.memory_space<vmem>>, vector<1x512xf32>
    %cst_35 = arith.constant 1.000000e+02 : f32
    %63 = vector.broadcast %cst_35 : f32 to vector<1x512xf32>
    %64 = arith.subf %63, %62 : vector<1x512xf32>
    %cst_36 = arith.constant 0.0101010101 : f32
    %65 = vector.broadcast %cst_36 : f32 to vector<1x512xf32>
    %66 = arith.mulf %64, %65 : vector<1x512xf32>
    %cst_37 = arith.constant 0.000000e+00 : f32
    %67 = vector.broadcast %cst_37 : f32 to vector<1x512xf32>
    %68 = arith.select %49, %66, %67 : vector<1x512xi1>, vector<1x512xf32>
    %69 = arith.maximumf %46, %68 : vector<1x512xf32>
    %c3 = arith.constant 3 : index
    %c0_38 = arith.constant 0 : index
    %70 = vector.load %arg1[%c3, %c0_38] : memref<4x512xi32, #tpu.memory_space<vmem>>, vector<1x512xi32>
    %c0_i32_39 = arith.constant 0 : i32
    %71 = vector.broadcast %c0_i32_39 : i32 to vector<1x512xi32>
    %72 = arith.cmpi sge, %70, %71 : vector<1x512xi32>
    %c3_40 = arith.constant 3 : index
    %c0_41 = arith.constant 0 : index
    %73 = vector.load %arg2[%c3_40, %c0_41] : memref<4x512xf32, #tpu.memory_space<vmem>>, vector<1x512xf32>
    %cst_42 = arith.constant 0.000000e+00 : f32
    %74 = vector.broadcast %cst_42 : f32 to vector<1x512xf32>
    %75 = arith.subf %74, %73 : vector<1x512xf32>
    %cst_43 = arith.constant 1.000000e+02 : f32
    %76 = vector.broadcast %cst_43 : f32 to vector<1x512xf32>
    %77 = arith.mulf %75, %76 : vector<1x512xf32>
    %78 = arith.negf %77 : vector<1x512xf32>
    %79 = math.exp %78 : vector<1x512xf32>
    %cst_44 = arith.constant 1.000000e+00 : f32
    %80 = vector.broadcast %cst_44 : f32 to vector<1x512xf32>
    %81 = arith.addf %80, %79 : vector<1x512xf32>
    %82 = arith.divf %80, %81 : vector<1x512xf32>
    %cst_45 = arith.constant 0.000000e+00 : f32
    %83 = vector.broadcast %cst_45 : f32 to vector<1x512xf32>
    %84 = arith.select %72, %82, %83 : vector<1x512xi1>, vector<1x512xf32>
    %c3_46 = arith.constant 3 : index
    %c0_47 = arith.constant 0 : index
    %85 = vector.load %arg3[%c3_46, %c0_47] : memref<4x512xf32, #tpu.memory_space<vmem>>, vector<1x512xf32>
    %cst_48 = arith.constant 1.000000e+02 : f32
    %86 = vector.broadcast %cst_48 : f32 to vector<1x512xf32>
    %87 = arith.subf %86, %85 : vector<1x512xf32>
    %cst_49 = arith.constant 0.0101010101 : f32
    %88 = vector.broadcast %cst_49 : f32 to vector<1x512xf32>
    %89 = arith.mulf %87, %88 : vector<1x512xf32>
    %cst_50 = arith.constant 0.000000e+00 : f32
    %90 = vector.broadcast %cst_50 : f32 to vector<1x512xf32>
    %91 = arith.select %72, %89, %90 : vector<1x512xi1>, vector<1x512xf32>
    %92 = arith.maximumf %69, %91 : vector<1x512xf32>
    %cst_51 = arith.constant 1.000000e-10 : f32
    %93 = vector.broadcast %cst_51 : f32 to vector<1x512xf32>
    %94 = arith.subf %93, %92 : vector<1x512xf32>
    %cst_52 = arith.constant 1.000000e+02 : f32
    %95 = vector.broadcast %cst_52 : f32 to vector<1x512xf32>
    %96 = arith.mulf %94, %95 : vector<1x512xf32>
    %97 = math.exp %96 : vector<1x512xf32>
    %cst_53 = arith.constant 1.000000e-10 : f32
    %98 = vector.broadcast %cst_53 : f32 to vector<1x512xf32>
    %99 = arith.maximumf %97, %98 : vector<1x512xf32>
    %c0_54 = arith.constant 0 : index
    %c0_55 = arith.constant 0 : index
    %100 = vector.load %arg5[%c0_54, %c0_55] : memref<8x1xf32, #tpu.memory_space<vmem>>, vector<8x1xf32>
    %101 = vector.broadcast %99 : vector<1x512xf32> to vector<8x512xf32>
    %102 = vector.broadcast %100 : vector<8x1xf32> to vector<8x512xf32>
    %103 = arith.mulf %101, %102 : vector<8x512xf32>
    %104 = arith.subf %22, %92 : vector<1x512xf32>
    %cst_56 = arith.constant 1.000000e+02 : f32
    %105 = vector.broadcast %cst_56 : f32 to vector<1x512xf32>
    %106 = arith.mulf %104, %105 : vector<1x512xf32>
    %107 = math.exp %106 : vector<1x512xf32>
    %108 = arith.mulf %15, %107 : vector<1x512xf32>
    %109 = arith.addf %99, %108 : vector<1x512xf32>
    %c0_57 = arith.constant 0 : index
    %c0_58 = arith.constant 0 : index
    %c0_59 = arith.constant 0 : index
    %110 = vector.load %arg4[%c0_57, %c0_58, %c0_59] : memref<4x8x512xbf16, #tpu.memory_space<vmem>>, vector<1x8x512xbf16>
    %111 = vector.shape_cast %110 : vector<1x8x512xbf16> to vector<8x512xbf16>
    %112 = arith.extf %111 : vector<8x512xbf16> to vector<8x512xf32>
    %113 = vector.broadcast %108 : vector<1x512xf32> to vector<8x512xf32>
    %114 = arith.mulf %113, %112 : vector<8x512xf32>
    %115 = arith.addf %103, %114 : vector<8x512xf32>
    %116 = arith.subf %45, %92 : vector<1x512xf32>
    %cst_60 = arith.constant 1.000000e+02 : f32
    %117 = vector.broadcast %cst_60 : f32 to vector<1x512xf32>
    %118 = arith.mulf %116, %117 : vector<1x512xf32>
    %119 = math.exp %118 : vector<1x512xf32>
    %120 = arith.mulf %38, %119 : vector<1x512xf32>
    %121 = arith.addf %109, %120 : vector<1x512xf32>
    %c1_61 = arith.constant 1 : index
    %c0_62 = arith.constant 0 : index
    %c0_63 = arith.constant 0 : index
    %122 = vector.load %arg4[%c1_61, %c0_62, %c0_63] : memref<4x8x512xbf16, #tpu.memory_space<vmem>>, vector<1x8x512xbf16>
    %123 = vector.shape_cast %122 : vector<1x8x512xbf16> to vector<8x512xbf16>
    %124 = arith.extf %123 : vector<8x512xbf16> to vector<8x512xf32>
    %125 = vector.broadcast %120 : vector<1x512xf32> to vector<8x512xf32>
    %126 = arith.mulf %125, %124 : vector<8x512xf32>
    %127 = arith.addf %115, %126 : vector<8x512xf32>
    %128 = arith.subf %68, %92 : vector<1x512xf32>
    %cst_64 = arith.constant 1.000000e+02 : f32
    %129 = vector.broadcast %cst_64 : f32 to vector<1x512xf32>
    %130 = arith.mulf %128, %129 : vector<1x512xf32>
    %131 = math.exp %130 : vector<1x512xf32>
    %132 = arith.mulf %61, %131 : vector<1x512xf32>
    %133 = arith.addf %121, %132 : vector<1x512xf32>
    %c2_65 = arith.constant 2 : index
    %c0_66 = arith.constant 0 : index
    %c0_67 = arith.constant 0 : index
    %134 = vector.load %arg4[%c2_65, %c0_66, %c0_67] : memref<4x8x512xbf16, #tpu.memory_space<vmem>>, vector<1x8x512xbf16>
    %135 = vector.shape_cast %134 : vector<1x8x512xbf16> to vector<8x512xbf16>
    %136 = arith.extf %135 : vector<8x512xbf16> to vector<8x512xf32>
    %137 = vector.broadcast %132 : vector<1x512xf32> to vector<8x512xf32>
    %138 = arith.mulf %137, %136 : vector<8x512xf32>
    %139 = arith.addf %127, %138 : vector<8x512xf32>
    %140 = arith.subf %91, %92 : vector<1x512xf32>
    %cst_68 = arith.constant 1.000000e+02 : f32
    %141 = vector.broadcast %cst_68 : f32 to vector<1x512xf32>
    %142 = arith.mulf %140, %141 : vector<1x512xf32>
    %143 = math.exp %142 : vector<1x512xf32>
    %144 = arith.mulf %84, %143 : vector<1x512xf32>
    %145 = arith.addf %133, %144 : vector<1x512xf32>
    %c3_69 = arith.constant 3 : index
    %c0_70 = arith.constant 0 : index
    %c0_71 = arith.constant 0 : index
    %146 = vector.load %arg4[%c3_69, %c0_70, %c0_71] : memref<4x8x512xbf16, #tpu.memory_space<vmem>>, vector<1x8x512xbf16>
    %147 = vector.shape_cast %146 : vector<1x8x512xbf16> to vector<8x512xbf16>
    %148 = arith.extf %147 : vector<8x512xbf16> to vector<8x512xf32>
    %149 = vector.broadcast %144 : vector<1x512xf32> to vector<8x512xf32>
    %150 = arith.mulf %149, %148 : vector<8x512xf32>
    %151 = arith.addf %139, %150 : vector<8x512xf32>
    %152 = tpu.reciprocal %145 {approx = true} : vector<1x512xf32> -> vector<1x512xf32>
    %153 = vector.broadcast %152 : vector<1x512xf32> to vector<8x512xf32>
    %154 = arith.mulf %151, %153 : vector<8x512xf32>
    %c0_72 = arith.constant 0 : index
    %c0_73 = arith.constant 0 : index
    %155 = vector.load %arg6[%c0_72, %c0_73] : memref<8x512xf32, #tpu.memory_space<vmem>>, vector<8x512xf32>
    tpu.vector_store %arg6[%c0_72, %c0_73], %154 {strides = array<i32>} : memref<8x512xf32, #tpu.memory_space<vmem>>, vector<8x512xf32>,
    return
  }
  func.func @transform_0(%arg0: i32) -> (i32, i32) {
    %c0_i32 = arith.constant 0 : i32
    %c0_i32_0 = arith.constant 0 : i32
    return %c0_i32, %arg0 : i32, i32
  }
  func.func @transform_1(%arg0: i32) -> (i32, i32) {
    %c0_i32 = arith.constant 0 : i32
    %c0_i32_0 = arith.constant 0 : i32
    return %c0_i32, %arg0 : i32, i32
  }
  func.func @transform_2(%arg0: i32) -> (i32, i32) {
    %c0_i32 = arith.constant 0 : i32
    %c0_i32_0 = arith.constant 0 : i32
    return %c0_i32, %arg0 : i32, i32
  }
  func.func @transform_3(%arg0: i32) -> (i32, i32, i32) {
    %c0_i32 = arith.constant 0 : i32
    %c0_i32_0 = arith.constant 0 : i32
    %c0_i32_1 = arith.constant 0 : i32
    return %c0_i32, %c0_i32_0, %arg0 : i32, i32, i32
  }
  func.func @transform_4(%arg0: i32) -> (i32, i32) {
    %c0_i32 = arith.constant 0 : i32
    %c0_i32_0 = arith.constant 0 : i32
    %c0_i32_1 = arith.constant 0 : i32
    return %c0_i32, %c0_i32_0 : i32, i32
  }
  func.func @transform_5(%arg0: i32) -> (i32, i32) {
    %c0_i32 = arith.constant 0 : i32
    %c0_i32_0 = arith.constant 0 : i32
    return %c0_i32, %arg0 : i32, i32
  }
}

</mosaic_0001>

<bundles_post_ra>
// kernel: tpu_custom_call.1
= control target key start
LH: loop header
LB: loop body
LE: loop exit
PB: predicated region body
PF: predicated region fallthrough
CT: control target
= control target key end

     0   :  { %10 = vsyncpa [#allocation3], 0  ;;  %s716_s0 = inlined_call_operand.hbm [shape: s32[4,512], index: 0, kind: input, shape index: {}]   ;;  %s717_s1 = inlined_call_operand.hbm [shape: f32[4,512], index: 1, kind: input, shape index: {}]   ;;  %s718_s2 = inlined_call_operand.vmem [shape: f32[4,512], index: 2, kind: input, shape index: {}]   ;;  %s719_s3 = inlined_call_operand.hbm [shape: bf16[4,8,512], index: 3, kind: input, shape index: {}]   ;;  %s720_s4 = inlined_call_operand.vmem [shape: f32[8,1], index: 4, kind: input, shape index: {}]   ;;  %s721_s5 = inlined_call_operand.hbm [shape: f32[8,512], index: 5, kind: output, shape index: {}]  }
   0x1   :  { %11 = vsyncpa [#allocation6], 0 }
   0x2   :  { %12 = vsyncpa [#allocation4], 0  ;;  %s521_s18 = smov [#allocation5]   ;;  %s522_s20 = smov [#allocation2]  }
   0x3   :  { %s29_s19 = sshll.u32 %s521_s18, 4  ;;  %s19_s21 = sshll.u32 %s522_s20, 4  ;;  %s30_s19 = int_to_ptr.vmem [resolvable:$true] %s29_s19  ;;  %s20_s21 = int_to_ptr.vmem [resolvable:$true] %s19_s21 }
   0x4   :  { %s427_s24 = scalar_lea.hbm %s717_s1, 256 }
   0x5   :  { %p428_p0 = scmp.ne.s32.totalorder %s717_s1, %s427_s24  ;;  %p431_p1 = scmp.lt.u32.totalorder %s427_s24, %s717_s1 }
   0x7   :  { %p433_p2 = pnand %p431_p1, %p428_p0 }
   0x9   :  { %436 = shalt.err (!%p433_p2)
}
   0xa   :  { %s437_s29 = scalar_lea.vmem %s30_s19, 256  ;;  %p442_p4 = scmp.lt.s32.totalorder %s30_s19, %s30_s19 }
   0xb   :  { %p438_p3 = scmp.ne.s32.totalorder %s30_s19, %s437_s29  ;;  %p443_p5 = scmp.lt.s32.totalorder %s437_s29, %s437_s29 }
   0xd   :  { %p444_p6 = por %p443_p5, %p442_p4 }
   0xf   :  { %p445_p7 = pnand %p444_p6, %p438_p3 }
  0x11   :  { %448 = shalt.err (!%p445_p7)
}
  0x12   :  { %32 = dma.hbm_to_vmem [thread:$0]  %s717_s1, 256, %s30_s19, [#allocation6]  }
  0x13   :  { %s449_s9 = scalar_lea.hbm %s716_s0, 256 }
  0x14   :  { %p450_p8 = scmp.ne.s32.totalorder %s716_s0, %s449_s9  ;;  %p453_p9 = scmp.lt.u32.totalorder %s449_s9, %s716_s0 }
  0x16   :  { %p455_p10 = pnand %p453_p9, %p450_p8 }
  0x18   :  { %458 = shalt.err (!%p455_p10)
}
  0x19   :  { %s459_s14 = scalar_lea.vmem %s20_s21, 256  ;;  %p464_p12 = scmp.lt.s32.totalorder %s20_s21, %s20_s21 }
  0x1a   :  { %p460_p11 = scmp.ne.s32.totalorder %s20_s21, %s459_s14  ;;  %p465_p13 = scmp.lt.s32.totalorder %s459_s14, %s459_s14 }
  0x1c   :  { %p466_p0 = por %p465_p13, %p464_p12 }
  0x1e   :  { %p467_p1 = pnand %p466_p0, %p460_p11 }
  0x20   :  { %470 = shalt.err (!%p467_p1)
}
  0x21   :  { %22 = dma.hbm_to_vmem [thread:$0]  %s716_s0, 256, %s20_s21, [#allocation3]  }
  0x22   :  { %s523_s16 = smov [#allocation7]   ;;  %s471_s20 = scalar_lea.hbm %s719_s3, 1024 }
  0x23   :  { %s40_s17 = sshll.u32 %s523_s16, 4  ;;  %p472_p2 = scmp.ne.s32.totalorder %s719_s3, %s471_s20  ;;  %s41_s17 = int_to_ptr.vmem [resolvable:$true] %s40_s17 }
  0x24   :  { %p475_p3 = scmp.lt.u32.totalorder %s471_s20, %s719_s3 }
  0x26   :  { %p477_p4 = pnand %p475_p3, %p472_p2 }
  0x28   :  { %480 = shalt.err (!%p477_p4)
}
  0x29   :  { %s481_s26 = scalar_lea.vmem %s41_s17, 1024  ;;  %p486_p6 = scmp.lt.s32.totalorder %s41_s17, %s41_s17 }
  0x2a   :  { %p482_p5 = scmp.ne.s32.totalorder %s41_s17, %s481_s26  ;;  %p487_p7 = scmp.lt.s32.totalorder %s481_s26, %s481_s26 }
  0x2c   :  { %p488_p8 = por %p487_p7, %p486_p6 }
  0x2e   :  { %p489_p9 = pnand %p488_p8, %p482_p5 }
  0x30   :  { %492 = shalt.err (!%p489_p9)
}
  0x31   :  { %s524_s0 = smov 256   ;;  %s525_s21 = smov 16  }
  0x32   :  { %46 = dma.hbm_to_vmem [thread:$0]  %s719_s3, 1024, %s41_s17, [#allocation6], %s524_s0, %s524_s0, %s525_s21  }
  0x33   :  { %515 = dma.done.wait [#allocation3], 256  }
  0x34   :  { %516 = vsyncadd [#allocation3], 4294967040 }
  0x35   :  { %517 = dma.done.wait [#allocation6], 1280  }
  0x36   :  { %518 = vsyncadd [#allocation6], 4294966016  ;;  %v526_v0 = vmov 0   ;;  %v140_v1 = vld [vmem:[%s720_s4] sm:$0xff] }
  0x37   :  { %398 = vset.pattern.permute.xlu0 %v526_v0  ;;  %v70_v2 = vld [vmem:[%s718_s2] ss:$4 sm:$0xf]  ;;  %v386_v4 = vld [vmem:[%s718_s2 + $0x1] ss:$4 sm:$0xf] }
  0x38   :  { %164 = vperm.xlu0 %398, %v140_v1   ;;  %v71_v3 = vsub.f32 100.0, %v70_v2  ;;  %v603_v5 = vld [vmem:[#allocation2] ss:$4 sm:$0xf]  ;;  %v91_v9 = vsub.f32 100.0, %v386_v4 }
  0x39   :  { %v60_v6 = vld [vmem:[#allocation5] ss:$4 sm:$0xf]  ;;  %v605_v8 = vld [vmem:[#allocation2 + $0x1] ss:$4 sm:$0xf] }
  0x3a   :  { %v72_v7 = vmul.f32 0.01010101, %v71_v3  ;;  %vm59_vm0 = vcmp.ge.s32.totalorder %v603_v5, 0  ;;  %v388_v10 = vld [vmem:[%s718_s2 + $0x2] ss:$4 sm:$0xf] }
  0x3b   :  { %v61_v11 = vsub.f32 0.0, %v60_v6  ;;  %vm77_vm1 = vcmp.ge.s32.totalorder %v605_v8, 0  ;;  %v92_v13 = vmul.f32 0.01010101, %v91_v9  ;;  %v111_v14 = vsub.f32 100.0, %v388_v10 }
  0x3c   :  { %v73_v12 = vsel %vm59_vm0, %v72_v7, 0.0  ;;  %v79_v15 = vld [vmem:[#allocation5 + $0x1] ss:$4 sm:$0xf] }
  0x3d   :  { %v390_v16 = vld [vmem:[%s718_s2 + $0x3] ss:$4 sm:$0xf]  ;;  %v617_v17 = vld [vmem:[#allocation2 + $0x2] ss:$4 sm:$0xf] }
  0x3e   :  { %v384_v18 = vmul.f32 -100.0, %v61_v11  ;;  %v74_v19 = vmax.f32 %v73_v12, 1e-10  ;;  %v80_v20 = vsub.f32 0.0, %v79_v15  ;;  %v93_v21 = vsel %vm77_vm1, %v92_v13, 0.0  ;;  %s527_s2 = smov [#allocation8]  }
  0x3f   :  { %v112_v22 = vmul.f32 0.01010101, %v111_v14  ;;  %v131_v23 = vsub.f32 100.0, %v390_v16  ;;  %vm97_vm2 = vcmp.ge.s32.totalorder %v617_v17, 0  ;;  %s374_s12 = sshll.u32 %s527_s2, 4  ;;  %s375_s12 = int_to_ptr.vmem [resolvable:$true] %s374_s12 }
  0x40   :  { %v99_v24 = vld [vmem:[#allocation5 + $0x2] ss:$4 sm:$0xf]  ;;  %v622_v25 = vld [vmem:[#allocation2 + $0x3] ss:$4 sm:$0xf]  ;;  %v94_v27 = vmax.f32 %v74_v19, %v93_v21  ;;  %p498_p11 = scmp.lt.s32.totalorder %s375_s12, %s375_s12 }
  0x41   :  { %v64_v26 = vmul.f32 1.442695, %v384_v18  ;;  %v385_v28 = vmul.f32 -100.0, %v80_v20  ;;  %v100_v29 = vsub.f32 0.0, %v99_v24  ;;  %v113_v30 = vsel %vm97_vm2, %v112_v22, 0.0  ;;  %s493_s13 = scalar_lea.vmem %s375_s12, 512 }
  0x42   :  { %v132_v31 = vmul.f32 0.01010101, %v131_v23  ;;  %vm117_vm3 = vcmp.ge.s32.totalorder %v622_v25, 0  ;;  %v119_v32 = vld [vmem:[#allocation5 + $0x3] ss:$4 sm:$0xf]  ;;  %v114_v33 = vmax.f32 %v94_v27, %v113_v30  ;;  %v142_v18 = vlaneseq  ;;  %p494_p10 = scmp.ne.s32.totalorder %s375_s12, %s493_s13  ;;  %p499_p12 = scmp.lt.s32.totalorder %s493_s13, %s493_s13 }
  0x43   :  { %399 = vpow2.f32 %v64_v26  ;;  %v83_v34 = vmul.f32 1.442695, %v385_v28  ;;  %v387_v35 = vmul.f32 -100.0, %v100_v29  ;;  %v120_v36 = vsub.f32 0.0, %v119_v32  ;;  %v177_v26 = vld [vmem:[#allocation7] sm:$0xff]  ;;  %v178_v27 = vld [vmem:[#allocation7 + $0x8] sm:$0xff] }
  0x44   :  { %v133_v37 = vsel %vm117_vm3, %v132_v31, 0.0  ;;  %v143_v22 = vshrl.u32 %v142_v18, 7  ;;  %v219_v28 = vld [vmem:[#allocation7 + $0x10] sm:$0xff]  ;;  %v261_v31 = vld [vmem:[#allocation7 + $0x20] sm:$0xff]  ;;  %v179_v25 = vunpack.c.l.bf16 %v177_v26  ;;  %p500_p13 = por %p499_p12, %p498_p11 }
  0x45   :  { %v134_v38 = vmax.f32 %v114_v33, %v133_v37  ;;  %401 = vpow2.f32 %v83_v34  ;;  %v103_v39 = vmul.f32 1.442695, %v387_v35  ;;  %v389_v40 = vmul.f32 -100.0, %v120_v36  ;;  %v262_v34 = vld [vmem:[#allocation7 + $0x28] sm:$0xff] }
  0x46   :  { %v651_v17 = vsub.s32 0, %v143_v22  ;;  %v653_v29 = vsub.s32 1, %v143_v22  ;;  %v655_v32 = vsub.s32 2, %v143_v22  ;;  %v657_v33 = vsub.s32 3, %v143_v22  ;;  %p501_p0 = pnand %p500_p13, %p494_p10 }
  0x47   :  { %v135_v41 = vsub.f32 1e-10, %v134_v38  ;;  %403 = vpow2.f32 %v103_v39  ;;  %v123_v42 = vmul.f32 1.442695, %v389_v40  ;;  %v171_v43 = vsub.f32 %v73_v12, %v134_v38 }
  0x48   :  { %v212_v47 = vsub.f32 %v93_v21, %v134_v38  ;;  %v254_v53 = vsub.f32 %v113_v30, %v134_v38  ;;  %v296_v58 = vsub.f32 %v133_v37, %v134_v38  ;;  %v220_v30 = vld [vmem:[#allocation7 + $0x18] sm:$0xff]  ;;  %v180_v36 = vunpack.c.h.bf16 %v177_v26 }
  0x49   :  { %v136_v45 = vmul.f32 100.0, %v135_v41  ;;  %405 = vpow2.f32 %v123_v42  ;;  %v172_v46 = vmul.f32 100.0, %v171_v43  ;;  %v181_v37 = vunpack.c.l.bf16 %v178_v27 }
  0x4a   :  { %v213_v52 = vmul.f32 100.0, %v212_v47  ;;  %v255_v57 = vmul.f32 100.0, %v254_v53  ;;  %v297_v62 = vmul.f32 100.0, %v296_v58  ;;  %v182_v38 = vunpack.c.h.bf16 %v178_v27 }
  0x4b   :  { %v137_v50 = vmul.f32 1.442695, %v136_v45  ;;  %v173_v51 = vmul.f32 1.442695, %v172_v46  ;;  %v221_v39 = vunpack.c.l.bf16 %v219_v28  ;;  %v222_v40 = vunpack.c.h.bf16 %v219_v28  ;;  %v304_v45 = vld [vmem:[#allocation7 + $0x38] sm:$0xff] }
  0x4c   :  { %v214_v56 = vmul.f32 1.442695, %v213_v52  ;;  %v256_v61 = vmul.f32 1.442695, %v255_v57  ;;  %v298_v1 = vmul.f32 1.442695, %v297_v62  ;;  %v223_v41 = vunpack.c.l.bf16 %v220_v30 }
  0x4d   :  { %v400_v44 = vpop.eup %399  ;;  %v224_v42 = vunpack.c.h.bf16 %v220_v30  ;;  %v263_v43 = vunpack.c.l.bf16 %v261_v31  ;;  %v264_v46 = vunpack.c.h.bf16 %v261_v31  ;;  %v265_v47 = vunpack.c.l.bf16 %v262_v34 }
  0x4e   :  { %v66_v48 = vadd.f32 1.0, %v400_v44  ;;  %v303_v44 = vld [vmem:[#allocation7 + $0x30] sm:$0xff] }
  0x4f   :  { %v402_v49 = vpop.eup %401  ;;  %v305_v53 = vunpack.c.l.bf16 %v303_v44 }
  0x50   :  { %407 = vrcp.f32 %v66_v48  ;;  %v85_v54 = vadd.f32 1.0, %v402_v49  ;;  %v266_v48 = vunpack.c.h.bf16 %v262_v34 }
  0x51   :  { %v404_v55 = vpop.eup %403  ;;  %409 = vpow2.f32 %v137_v50 }
  0x52   :  { %411 = vpow2.f32 %v173_v51  ;;  %v105_v59 = vadd.f32 1.0, %v404_v55  ;;  %v307_v55 = vunpack.c.l.bf16 %v304_v45 }
  0x53   :  { %413 = vrcp.f32 %v85_v54  ;;  %v406_v60 = vpop.eup %405  ;;  %v306_v54 = vunpack.c.h.bf16 %v303_v44 }
  0x54   :  { %415 = vpow2.f32 %v214_v56  ;;  %v125_v63 = vadd.f32 1.0, %v406_v60  ;;  %v308_v56 = vunpack.c.h.bf16 %v304_v45 }
  0x55   :  { %417 = vrcp.f32 %v105_v59 }
  0x56   :  { %419 = vpow2.f32 %v256_v61 }
  0x57   :  { %421 = vrcp.f32 %v125_v63 }
  0x58   :  { %423 = vpow2.f32 %v298_v1 }
  0x5a   :  { %v408_v0 = vpop.eup %407 }
  0x5b   :  { %v410_v2 = vpop.eup %409  ;;  %v69_v4 = vsel %vm59_vm0, %v408_v0, 0.0 }
  0x5c   :  { %v412_v3 = vpop.eup %411  ;;  %v631_v7 = vmax.f32 %v410_v2, 1e-10 }
  0x5d   :  { %v414_v6 = vpop.eup %413  ;;  %v633_v9 = vmul.f32 %v412_v3, %v69_v4 }
  0x5e   :  { %v416_v10 = vpop.eup %415  ;;  %v88_v11 = vsel %vm77_vm1, %v414_v6, 0.0  ;;  %v145_v61 = vrot.slane %v631_v7, %v651_v17  ;;  %v149_v62 = vrot.slane %v631_v7, %v653_v29  ;;  %v153_v63 = vrot.slane %v631_v7, %v655_v32 }
  0x5f   :  { %v418_v12 = vpop.eup %417  ;;  %v176_v13 = vadd.f32 %v633_v9, %v631_v7  ;;  %v639_v14 = vmul.f32 %v416_v10, %v88_v11  ;;  %v187_v49 = vrot.slane %v633_v9, %v651_v17  ;;  %v191_v50 = vrot.slane %v633_v9, %v653_v29 }
  0x60   :  { %v420_v15 = vpop.eup %419  ;;  %v108_v5 = vsel %vm97_vm2, %v418_v12, 0.0  ;;  %v195_v51 = vrot.slane %v633_v9, %v655_v32  ;;  %v199_v52 = vrot.slane %v633_v9, %v657_v33  ;;  %v157_v0 = vrot.slane %v631_v7, %v657_v33 }
  0x61   :  { %v422_v16 = vpop.eup %421  ;;  %v217_v19 = vadd.f32 %v639_v14, %v176_v13  ;;  %v644_v20 = vmul.f32 %v420_v15, %v108_v5  ;;  %v229_v57 = vrot.slane %v639_v14, %v651_v17  ;;  %v233_v58 = vrot.slane %v639_v14, %v653_v29 }
  0x62   :  { %v424_v21 = vpop.eup %423  ;;  %v128_v8 = vsel %vm117_vm3, %v422_v16, 0.0  ;;  %v237_v59 = vrot.slane %v639_v14, %v655_v32  ;;  %v241_v60 = vrot.slane %v639_v14, %v657_v33  ;;  %v204_v1 = vmul.f32 %v187_v49, %v179_v25 }
  0x63   :  { %v259_v23 = vadd.f32 %v644_v20, %v217_v19  ;;  %v649_v24 = vmul.f32 %v424_v21, %v128_v8  ;;  %v205_v2 = vmul.f32 %v191_v50, %v180_v36  ;;  %v206_v3 = vmul.f32 %v195_v51, %v181_v37 }
  0x64   :  { %v207_v4 = vmul.f32 %v199_v52, %v182_v38  ;;  %v271_v6 = vrot.slane %v644_v20, %v651_v17  ;;  %v275_v9 = vrot.slane %v644_v20, %v653_v29  ;;  %v279_v10 = vrot.slane %v644_v20, %v655_v32 }
  0x65   :  { %v301_v35 = vadd.f32 %v649_v24, %v259_v23  ;;  %v283_v11 = vrot.slane %v644_v20, %v657_v33  ;;  %v246_v12 = vmul.f32 %v229_v57, %v221_v39  ;;  %v247_v13 = vmul.f32 %v233_v58, %v222_v40 }
  0x66   :  { %v248_v14 = vmul.f32 %v237_v59, %v223_v41  ;;  %v249_v7 = vmul.f32 %v241_v60, %v224_v42  ;;  %v313_v5 = vrot.slane %v649_v24, %v651_v17  ;;  %v317_v16 = vrot.slane %v649_v24, %v653_v29 }
  0x67   :  { %425 = vrcp.f32 %v301_v35  ;;  %v321_v18 = vrot.slane %v649_v24, %v655_v32  ;;  %v325_v19 = vrot.slane %v649_v24, %v657_v33  ;;  %v288_v23 = vmul.f32 %v271_v6, %v263_v43 }
  0x68   :  { %v289_v26 = vmul.f32 %v275_v9, %v264_v46  ;;  %v290_v27 = vmul.f32 %v279_v10, %v265_v47  ;;  %v291_v28 = vmul.f32 %v283_v11, %v266_v48  ;;  %v330_v36 = vmul.f32 %v313_v5, %v305_v53 }
  0x69   :  { %v331_v37 = vmul.f32 %v317_v16, %v306_v54  ;;  %v332_v38 = vmul.f32 %v321_v18, %v307_v55  ;;  %v333_v39 = vmul.f32 %v325_v19, %v308_v56 }
  0x71   :  { %v426_v30 = vpop.eup %425 }
  0x72   :  { %v343_v44 = vrot.slane %v426_v30, %v651_v17  ;;  %v347_v43 = vrot.slane %v426_v30, %v653_v29  ;;  %v351_v45 = vrot.slane %v426_v30, %v655_v32  ;;  %v355_v46 = vrot.slane %v426_v30, %v657_v33 }
  0xb7   :  { %v165_v15 = vpop.permute.xlu0 %164 }
  0xb8   :  { %v167_v21 = vmul.f32 %v165_v15, %v145_v61  ;;  %v168_v8 = vmul.f32 %v165_v15, %v149_v62  ;;  %v169_v20 = vmul.f32 %v165_v15, %v153_v63  ;;  %v170_v22 = vmul.f32 %v165_v15, %v157_v0 }
  0xba   :  { %v208_v31 = vadd.f32 %v204_v1, %v167_v21  ;;  %v209_v25 = vadd.f32 %v205_v2, %v168_v8  ;;  %v210_v34 = vadd.f32 %v206_v3, %v169_v20  ;;  %v211_v35 = vadd.f32 %v207_v4, %v170_v22 }
  0xbc   :  { %v250_v40 = vadd.f32 %v246_v12, %v208_v31  ;;  %v251_v41 = vadd.f32 %v247_v13, %v209_v25  ;;  %v252_v24 = vadd.f32 %v248_v14, %v210_v34  ;;  %v253_v42 = vadd.f32 %v249_v7, %v211_v35 }
  0xbe   :  { %v292_v47 = vadd.f32 %v288_v23, %v250_v40  ;;  %v293_v48 = vadd.f32 %v289_v26, %v251_v41  ;;  %v294_v49 = vadd.f32 %v290_v27, %v252_v24  ;;  %v295_v50 = vadd.f32 %v291_v28, %v253_v42 }
  0xc0   :  { %v334_v51 = vadd.f32 %v330_v36, %v292_v47  ;;  %v335_v52 = vadd.f32 %v331_v37, %v293_v48  ;;  %v336_v53 = vadd.f32 %v332_v38, %v294_v49  ;;  %v337_v54 = vadd.f32 %v333_v39, %v295_v50 }
  0xc2   :  { %v360_v55 = vmul.f32 %v343_v44, %v334_v51  ;;  %v361_v56 = vmul.f32 %v347_v43, %v335_v52  ;;  %v362_v57 = vmul.f32 %v351_v45, %v336_v53  ;;  %v363_v17 = vmul.f32 %v355_v46, %v337_v54 }
  0xc4   :  { %364 = vst [vmem:[#allocation8] sm:$0xff] %v360_v55  ;;  %365 = vst [vmem:[#allocation8 + $0x8] sm:$0xff] %v361_v56 }
  0xc5   :  { %366 = vst [vmem:[#allocation8 + $0x10] sm:$0xff] %v362_v57  ;;  %367 = vst [vmem:[#allocation8 + $0x18] sm:$0xff] %v363_v17 }
  0xc6   :  { %504 = shalt.err (!%p501_p0)
}
  0xc7   :  { %s505_s15 = scalar_lea.hbm %s721_s5, 512 }
  0xc8   :  { %p506_p1 = scmp.ne.s32.totalorder %s721_s5, %s505_s15  ;;  %p509_p2 = scmp.lt.u32.totalorder %s505_s15, %s721_s5 }
  0xca   :  { %p511_p3 = pnand %p509_p2, %p506_p1 }
  0xcc   :  { %514 = shalt.err (!%p511_p3)
}
  0xcd   :  { %377 = dma.vmem_to_hbm [thread:$0]  %s375_s12, 512, %s721_s5, [#allocation4]  }
  0xce   :  { %519 = dma.done.wait [#allocation4], 512  }
  0xcf   :  { %520 = vsyncadd [#allocation4], 4294966784 }
  0xd0   :  { %381 = vsyncpa [#allocation3], 1 }
  0xd1   :  { %382 = vsyncpa [#allocation6], 1 }
  0xd2   :  { %383 = vsyncpa [#allocation4], 1 }

</bundles_post_ra>
